<compile_context>
chip_gen: v6e
topology: v6e:2x2x1
jax: 0.10.0
libtpu: 0.0.40
codegen_flags: <defaults>
</compile_context>

<pallas_src>
import jax
import jax.numpy as jnp
from jax.experimental import pallas as pl
from jax.experimental.pallas import tpu as pltpu


def vae_forward_kernel(x_ref, eps_ref,
                       w1_ref, b1_ref, wh_ref, bh_ref,
                       w3_ref, b3_ref, w4_ref, b4_ref,
                       recon_ref, muvar_ref):
    # x/eps arrive in native f32 (no wrapper round-trip); cast to bf16 on the VPU
    # right before each MXU dot, accumulate in f32, keep ALL elementwise math in
    # f32 (required on v5e's f32-only VPU/EUP, harmless elsewhere).
    x = x_ref[...].astype(w1_ref.dtype)          # (tb, D_in) bf16 for the MXU
    eps = eps_ref[...]                            # (tb, L) f32, full precision

    # --- encode: fc1 + relu ---------------------------------------------------
    h1 = jnp.dot(x, w1_ref[...], preferred_element_type=jnp.float32) + b1_ref[...]
    h1 = jnp.maximum(h1, 0.0)

    # --- fused heads: one (tb, 2L) matmul instead of two (tb, L) matmuls -------
    muvar = jnp.dot(h1.astype(wh_ref.dtype), wh_ref[...],
                    preferred_element_type=jnp.float32) + bh_ref[...]
    L = muvar.shape[-1] // 2
    # NOTE: this lane split (at lane L, not an (8,128) tile boundary) may lower to
    # a small XLU shuffle / vreg copy; negligible at these feature dims.
    mu = muvar[:, :L]
    logvar = muvar[:, L:]

    # --- reparameterize (f32): z = mu + eps * exp(0.5 * logvar) ----------------
    z = mu + eps * jnp.exp(0.5 * logvar)

    # --- decode: fc3 + relu, fc4 + tanh -----------------------------------------
    h3 = jnp.dot(z.astype(w3_ref.dtype), w3_ref[...],
                 preferred_element_type=jnp.float32) + b3_ref[...]
    h3 = jnp.maximum(h3, 0.0)
    recon = jnp.tanh(jnp.dot(h3.astype(w4_ref.dtype), w4_ref[...],
                             preferred_element_type=jnp.float32) + b4_ref[...])

    recon_ref[...] = recon.astype(recon_ref.dtype)   # bf16 store: halves dominant HBM stream
    muvar_ref[...] = muvar                            # f32 fused mu|logvar slab


def _round_up(x, m):
    return -(-x // m) * m


def vec_vae_simple_forward(x, params, eps, *, tile_b=8192,
                           stream_budget_bytes=8 * 1024 * 1024):
    """x: (B, input_space) f32; eps: (B, latent) f32 (the randn_like draw).

    Returns (recon, mu, logvar) matching the torch module's forward().
    recon is bf16 (HBM-roofline win); mu/logvar are f32.
    """
    B, D_in = x.shape
    H = params["w1"].shape[1]
    L2 = params["w_heads"].shape[1]          # 2 * latent
    L = L2 // 2
    assert eps.shape == (B, L)

    # --- batch tile sizing ----------------------------------------------------
    # Double-buffered streamed bytes per batch row: x/eps/muvar f32 in/out, recon bf16 out.
    bytes_per_row = 2 * (4 * D_in + 4 * L + 2 * D_in + 4 * L2)
    tb = min(tile_b, max(8, stream_budget_bytes // max(bytes_per_row, 1)))
    # v7x megacore: keep >= 2 grid steps so both TensorCores get work.
    tb = min(tb, max(8, _round_up(pl.cdiv(B, 2), 8)))
    tb = _round_up(tb, 8)

    # Pad only to the sublane multiple (<= 7 rows); the trailing grid block may
    # overhang B_pad -- those rows are garbage but row-independent, their outputs
    # are masked/discarded, and we slice back to B below.
    B_pad = _round_up(B, 8)
    if B_pad != B:
        x = jnp.pad(x, ((0, B_pad - B), (0, 0)))
        eps = jnp.pad(eps, ((0, B_pad - B), (0, 0)))

    grid = (pl.cdiv(B_pad, tb),)
    batch_map = lambda i: (i, 0)       # streamed per-tile
    resident_map = lambda i: (0, 0)    # weights/biases stay VMEM-resident
    # TODO(synk): if feature dims grow, add pipeline_mode=pl.Buffered(1) on the
    #             resident weight specs to halve their VMEM footprint.

    out_shape = (
        jax.ShapeDtypeStruct((B_pad, D_in), jnp.bfloat16),   # recon (bf16 stream)
        jax.ShapeDtypeStruct((B_pad, L2), jnp.float32),      # fused mu|logvar
    )

    fn = pl.pallas_call(
        vae_forward_kernel,
        out_shape=out_shape,
        grid=grid,
        in_specs=[
            pl.BlockSpec((tb, D_in), batch_map),        # x (f32, streamed)
            pl.BlockSpec((tb, L), batch_map),           # eps (f32, streamed)
            pl.BlockSpec((D_in, H), resident_map),      # w1 (bf16)
            pl.BlockSpec((1, H), resident_map),         # b1 (f32)
            pl.BlockSpec((H, L2), resident_map),        # w_heads (fc21|fc22 fused, bf16)
            pl.BlockSpec((1, L2), resident_map),        # b_heads (f32)
            pl.BlockSpec((L, H), resident_map),         # w3 (bf16)
            pl.BlockSpec((1, H), resident_map),         # b3 (f32)
            pl.BlockSpec((H, D_in), resident_map),      # w4 (bf16)
            pl.BlockSpec((1, D_in), resident_map),      # b4 (f32)
        ],
        out_specs=(
            pl.BlockSpec((tb, D_in), batch_map),
            pl.BlockSpec((tb, L2), batch_map),
        ),
        compiler_params=pltpu.CompilerParams(
            dimension_semantics=("parallel",),
            vmem_limit_bytes=32 * 1024 * 1024,
        ),
    )

    recon, muvar = fn(
        x, eps,
        params["w1"], params["b1"],
        params["w_heads"], params["b_heads"],
        params["w3"], params["b3"],
        params["w4"], params["b4"],
    )
    recon = recon[:B]
    mu = muvar[:B, :L]
    logvar = muvar[:B, L:]
    return recon, mu, logvar


def init_params(key, input_space, latent_space):
    """Synthetic init matching torch's Linear layout, packed for the kernel:
    weights (in, out) in bf16 with the two encoder heads fused, biases (1, out) f32."""
    hidden = latent_space * 2
    ks = jax.random.split(key, 10)

    def lin(kw, kb, d_in, d_out):
        bound = 1.0 / jnp.sqrt(jnp.float32(d_in))
        w = jax.random.uniform(kw, (d_in, d_out), jnp.float32, -bound, bound)
        b = jax.random.uniform(kb, (1, d_out), jnp.float32, -bound, bound)
        return w, b

    w1, b1 = lin(ks[0], ks[1], input_space, hidden)
    w21, b21 = lin(ks[2], ks[3], hidden, latent_space)
    w22, b22 = lin(ks[4], ks[5], hidden, latent_space)
    w3, b3 = lin(ks[6], ks[7], latent_space, hidden)
    w4, b4 = lin(ks[8], ks[9], hidden, input_space)

    bf16 = jnp.bfloat16
    return dict(
        w1=w1.astype(bf16), b1=b1,
        w_heads=jnp.concatenate([w21, w22], axis=1).astype(bf16),
        b_heads=jnp.concatenate([b21, b22], axis=1),
        w3=w3.astype(bf16), b3=b3,
        w4=w4.astype(bf16), b4=b4,
    )


def reference_forward(x, params, eps):
    """Plain-JAX reference mirroring the kernel's precision schedule
    (f32 inputs, bf16 matmul operands, f32 accumulation, f32 elementwise, f32 eps)."""
    f32 = jnp.float32
    bf16 = jnp.bfloat16

    h1 = jnp.maximum(
        jnp.dot(x.astype(bf16), params["w1"], preferred_element_type=f32) + params["b1"], 0.0)
    muvar = jnp.dot(h1.astype(bf16), params["w_heads"],
                    preferred_element_type=f32) + params["b_heads"]
    L = muvar.shape[-1] // 2
    mu, logvar = muvar[:, :L], muvar[:, L:]
    z = mu + eps * jnp.exp(0.5 * logvar)
    h3 = jnp.maximum(
        jnp.dot(z.astype(bf16), params["w3"], preferred_element_type=f32) + params["b3"], 0.0)
    recon = jnp.tanh(
        jnp.dot(h3.astype(bf16), params["w4"], preferred_element_type=f32) + params["b4"])
    return recon, mu, logvar


if __name__ == "__main__":
    key = jax.random.PRNGKey(0)
    k_x, k_p, k_eps = jax.random.split(key, 3)

    B = 8
    INPUT_SPACE = 32
    LATENT_SPACE = 8

    x = jax.random.normal(k_x, (B, INPUT_SPACE), jnp.float32)
    params = init_params(k_p, INPUT_SPACE, LATENT_SPACE)
    # eps corresponds to torch.randn_like(std); generated deterministically here.
    eps = jax.random.normal(k_eps, (B, LATENT_SPACE), jnp.float32)

    recon, mu, logvar = vec_vae_simple_forward(x, params, eps)
    jax.block_until_ready((recon, mu, logvar))

    # sanity check against the pure-JAX reference (same precision schedule);
    # recon tolerance accounts for its bf16 output dtype.
    r_ref, mu_ref, lv_ref = reference_forward(x, params, eps)
    assert jnp.allclose(recon.astype(jnp.float32), r_ref, atol=2e-2, rtol=2e-2), "recon mismatch"
    assert jnp.allclose(mu, mu_ref, atol=1e-3, rtol=1e-3), "mu mismatch"
    assert jnp.allclose(logvar, lv_ref, atol=1e-3, rtol=1e-3), "logvar mismatch"

    print("KERNEL_OK")
</pallas_src>

<mosaic_0001>
module attributes {stable_mosaic.version = 11 : i64} {
  func.func @vae_forward_kernel(%arg0: i32, %arg1: memref<8x32xf32, #tpu.memory_space<vmem>>, %arg2: memref<8x8xf32, #tpu.memory_space<vmem>>, %arg3: memref<32x16xbf16, #tpu.memory_space<vmem>>, %arg4: memref<1x16xf32, #tpu.memory_space<vmem>>, %arg5: memref<16x16xbf16, #tpu.memory_space<vmem>>, %arg6: memref<1x16xf32, #tpu.memory_space<vmem>>, %arg7: memref<8x16xbf16, #tpu.memory_space<vmem>>, %arg8: memref<1x16xf32, #tpu.memory_space<vmem>>, %arg9: memref<16x32xbf16, #tpu.memory_space<vmem>>, %arg10: memref<1x32xf32, #tpu.memory_space<vmem>>, %arg11: memref<8x32xbf16, #tpu.memory_space<vmem>>, %arg12: memref<8x16xf32, #tpu.memory_space<vmem>>) attributes {dimension_semantics = [#tpu.dimension_semantics<parallel>], iteration_bounds = array<i64: 1>, scalar_prefetch = 0 : i64, scratch_operands = 0 : i64, tpu.core_type = #tpu.core_type<tc>, window_params = [{transform_indices = @transform_0, window_bounds = array<i64: 8, 32>}, {transform_indices = @transform_1, window_bounds = array<i64: 8, 8>}, {pipeline_mode = #tpu.pipeline_mode<synchronous>, transform_indices = @transform_2, window_bounds = array<i64: 32, 16>}, {pipeline_mode = #tpu.pipeline_mode<synchronous>, transform_indices = @transform_3, window_bounds = array<i64: 1, 16>}, {pipeline_mode = #tpu.pipeline_mode<synchronous>, transform_indices = @transform_4, window_bounds = array<i64: 16, 16>}, {pipeline_mode = #tpu.pipeline_mode<synchronous>, transform_indices = @transform_5, window_bounds = array<i64: 1, 16>}, {pipeline_mode = #tpu.pipeline_mode<synchronous>, transform_indices = @transform_6, window_bounds = array<i64: 8, 16>}, {pipeline_mode = #tpu.pipeline_mode<synchronous>, transform_indices = @transform_7, window_bounds = array<i64: 1, 16>}, {pipeline_mode = #tpu.pipeline_mode<synchronous>, transform_indices = @transform_8, window_bounds = array<i64: 16, 32>}, {pipeline_mode = #tpu.pipeline_mode<synchronous>, transform_indices = @transform_9, window_bounds = array<i64: 1, 32>}, {transform_indices = @transform_10, window_bounds = array<i64: 8, 32>}, {transform_indices = @transform_11, window_bounds = array<i64: 8, 16>}]} {
    %c0 = arith.constant 0 : index
    %c0_0 = arith.constant 0 : index
    %0 = vector.load %arg1[%c0, %c0_0] : memref<8x32xf32, #tpu.memory_space<vmem>>, vector<8x32xf32>
    %1 = arith.truncf %0 : vector<8x32xf32> to vector<8x32xbf16>
    %c0_1 = arith.constant 0 : index
    %c0_2 = arith.constant 0 : index
    %2 = vector.load %arg2[%c0_1, %c0_2] : memref<8x8xf32, #tpu.memory_space<vmem>>, vector<8x8xf32>
    %c0_3 = arith.constant 0 : index
    %c0_4 = arith.constant 0 : index
    %3 = vector.load %arg3[%c0_3, %c0_4] : memref<32x16xbf16, #tpu.memory_space<vmem>>, vector<32x16xbf16>
    %cst = arith.constant dense<0.000000e+00> : vector<8x16xf32>
    %4 = tpu.matmul %1, %3, %cst {dimension_numbers = #tpu.dot_dimension_numbers<[1], [0], [0], [1], [0, 0, 1, 1], [], []>} : vector<8x32xbf16>, vector<32x16xbf16>, vector<8x16xf32> -> vector<8x16xf32>
    %c0_5 = arith.constant 0 : index
    %c0_6 = arith.constant 0 : index
    %5 = vector.load %arg4[%c0_5, %c0_6] : memref<1x16xf32, #tpu.memory_space<vmem>>, vector<1x16xf32>
    %6 = vector.broadcast %5 : vector<1x16xf32> to vector<8x16xf32>
    %7 = arith.addf %4, %6 : vector<8x16xf32>
    %cst_7 = arith.constant 0.000000e+00 : f32
    %8 = vector.broadcast %cst_7 : f32 to vector<8x16xf32>
    %9 = arith.maximumf %7, %8 : vector<8x16xf32>
    %10 = arith.truncf %9 : vector<8x16xf32> to vector<8x16xbf16>
    %c0_8 = arith.constant 0 : index
    %c0_9 = arith.constant 0 : index
    %11 = vector.load %arg5[%c0_8, %c0_9] : memref<16x16xbf16, #tpu.memory_space<vmem>>, vector<16x16xbf16>
    %cst_10 = arith.constant dense<0.000000e+00> : vector<8x16xf32>
    %12 = tpu.matmul %10, %11, %cst_10 {dimension_numbers = #tpu.dot_dimension_numbers<[1], [0], [0], [1], [0, 0, 1, 1], [], []>} : vector<8x16xbf16>, vector<16x16xbf16>, vector<8x16xf32> -> vector<8x16xf32>
    %c0_11 = arith.constant 0 : index
    %c0_12 = arith.constant 0 : index
    %13 = vector.load %arg6[%c0_11, %c0_12] : memref<1x16xf32, #tpu.memory_space<vmem>>, vector<1x16xf32>
    %14 = vector.broadcast %13 : vector<1x16xf32> to vector<8x16xf32>
    %15 = arith.addf %12, %14 : vector<8x16xf32>
    %16 = vector.extract_strided_slice %15 {offsets = [0, 0], sizes = [8, 8], strides = [1, 1]} : vector<8x16xf32> to vector<8x8xf32>
    %17 = vector.extract_strided_slice %15 {offsets = [0, 8], sizes = [8, 8], strides = [1, 1]} : vector<8x16xf32> to vector<8x8xf32>
    %cst_13 = arith.constant 5.000000e-01 : f32
    %18 = vector.broadcast %cst_13 : f32 to vector<8x8xf32>
    %19 = arith.mulf %18, %17 : vector<8x8xf32>
    %20 = math.exp %19 : vector<8x8xf32>
    %21 = arith.mulf %2, %20 : vector<8x8xf32>
    %22 = arith.addf %16, %21 : vector<8x8xf32>
    %23 = arith.truncf %22 : vector<8x8xf32> to vector<8x8xbf16>
    %c0_14 = arith.constant 0 : index
    %c0_15 = arith.constant 0 : index
    %24 = vector.load %arg7[%c0_14, %c0_15] : memref<8x16xbf16, #tpu.memory_space<vmem>>, vector<8x16xbf16>
    %cst_16 = arith.constant dense<0.000000e+00> : vector<8x16xf32>
    %25 = tpu.matmul %23, %24, %cst_16 {dimension_numbers = #tpu.dot_dimension_numbers<[1], [0], [0], [1], [0, 0, 1, 1], [], []>} : vector<8x8xbf16>, vector<8x16xbf16>, vector<8x16xf32> -> vector<8x16xf32>
    %c0_17 = arith.constant 0 : index
    %c0_18 = arith.constant 0 : index
    %26 = vector.load %arg8[%c0_17, %c0_18] : memref<1x16xf32, #tpu.memory_space<vmem>>, vector<1x16xf32>
    %27 = vector.broadcast %26 : vector<1x16xf32> to vector<8x16xf32>
    %28 = arith.addf %25, %27 : vector<8x16xf32>
    %cst_19 = arith.constant 0.000000e+00 : f32
    %29 = vector.broadcast %cst_19 : f32 to vector<8x16xf32>
    %30 = arith.maximumf %28, %29 : vector<8x16xf32>
    %31 = arith.truncf %30 : vector<8x16xf32> to vector<8x16xbf16>
    %c0_20 = arith.constant 0 : index
    %c0_21 = arith.constant 0 : index
    %32 = vector.load %arg9[%c0_20, %c0_21] : memref<16x32xbf16, #tpu.memory_space<vmem>>, vector<16x32xbf16>
    %cst_22 = arith.constant dense<0.000000e+00> : vector<8x32xf32>
    %33 = tpu.matmul %31, %32, %cst_22 {dimension_numbers = #tpu.dot_dimension_numbers<[1], [0], [0], [1], [0, 0, 1, 1], [], []>} : vector<8x16xbf16>, vector<16x32xbf16>, vector<8x32xf32> -> vector<8x32xf32>
    %c0_23 = arith.constant 0 : index
    %c0_24 = arith.constant 0 : index
    %34 = vector.load %arg10[%c0_23, %c0_24] : memref<1x32xf32, #tpu.memory_space<vmem>>, vector<1x32xf32>
    %35 = vector.broadcast %34 : vector<1x32xf32> to vector<8x32xf32>
    %36 = arith.addf %33, %35 : vector<8x32xf32>
    %37 = math.tanh %36 : vector<8x32xf32>
    %38 = arith.truncf %37 : vector<8x32xf32> to vector<8x32xbf16>
    %c0_25 = arith.constant 0 : index
    %c0_26 = arith.constant 0 : index
    %39 = vector.load %arg11[%c0_25, %c0_26] : memref<8x32xbf16, #tpu.memory_space<vmem>>, vector<8x32xbf16>
    tpu.vector_store %arg11[%c0_25, %c0_26], %38 {strides = array<i32>} : memref<8x32xbf16, #tpu.memory_space<vmem>>, vector<8x32xbf16>,
    %c0_27 = arith.constant 0 : index
    %c0_28 = arith.constant 0 : index
    %40 = vector.load %arg12[%c0_27, %c0_28] : memref<8x16xf32, #tpu.memory_space<vmem>>, vector<8x16xf32>
    tpu.vector_store %arg12[%c0_27, %c0_28], %15 {strides = array<i32>} : memref<8x16xf32, #tpu.memory_space<vmem>>, vector<8x16xf32>,
    return
  }
  func.func @transform_0(%arg0: i32) -> (i32, i32) {
    %c0_i32 = arith.constant 0 : i32
    %c0_i32_0 = arith.constant 0 : i32
    return %arg0, %c0_i32 : i32, i32
  }
  func.func @transform_1(%arg0: i32) -> (i32, i32) {
    %c0_i32 = arith.constant 0 : i32
    %c0_i32_0 = arith.constant 0 : i32
    return %arg0, %c0_i32 : i32, i32
  }
  func.func @transform_2(%arg0: i32) -> (i32, i32) {
    %c0_i32 = arith.constant 0 : i32
    %c0_i32_0 = arith.constant 0 : i32
    %c0_i32_1 = arith.constant 0 : i32
    return %c0_i32, %c0_i32_0 : i32, i32
  }
  func.func @transform_3(%arg0: i32) -> (i32, i32) {
    %c0_i32 = arith.constant 0 : i32
    %c0_i32_0 = arith.constant 0 : i32
    %c0_i32_1 = arith.constant 0 : i32
    return %c0_i32, %c0_i32_0 : i32, i32
  }
  func.func @transform_4(%arg0: i32) -> (i32, i32) {
    %c0_i32 = arith.constant 0 : i32
    %c0_i32_0 = arith.constant 0 : i32
    %c0_i32_1 = arith.constant 0 : i32
    return %c0_i32, %c0_i32_0 : i32, i32
  }
  func.func @transform_5(%arg0: i32) -> (i32, i32) {
    %c0_i32 = arith.constant 0 : i32
    %c0_i32_0 = arith.constant 0 : i32
    %c0_i32_1 = arith.constant 0 : i32
    return %c0_i32, %c0_i32_0 : i32, i32
  }
  func.func @transform_6(%arg0: i32) -> (i32, i32) {
    %c0_i32 = arith.constant 0 : i32
    %c0_i32_0 = arith.constant 0 : i32
    %c0_i32_1 = arith.constant 0 : i32
    return %c0_i32, %c0_i32_0 : i32, i32
  }
  func.func @transform_7(%arg0: i32) -> (i32, i32) {
    %c0_i32 = arith.constant 0 : i32
    %c0_i32_0 = arith.constant 0 : i32
    %c0_i32_1 = arith.constant 0 : i32
    return %c0_i32, %c0_i32_0 : i32, i32
  }
  func.func @transform_8(%arg0: i32) -> (i32, i32) {
    %c0_i32 = arith.constant 0 : i32
    %c0_i32_0 = arith.constant 0 : i32
    %c0_i32_1 = arith.constant 0 : i32
    return %c0_i32, %c0_i32_0 : i32, i32
  }
  func.func @transform_9(%arg0: i32) -> (i32, i32) {
    %c0_i32 = arith.constant 0 : i32
    %c0_i32_0 = arith.constant 0 : i32
    %c0_i32_1 = arith.constant 0 : i32
    return %c0_i32, %c0_i32_0 : i32, i32
  }
  func.func @transform_10(%arg0: i32) -> (i32, i32) {
    %c0_i32 = arith.constant 0 : i32
    %c0_i32_0 = arith.constant 0 : i32
    return %arg0, %c0_i32 : i32, i32
  }
  func.func @transform_11(%arg0: i32) -> (i32, i32) {
    %c0_i32 = arith.constant 0 : i32
    %c0_i32_0 = arith.constant 0 : i32
    return %arg0, %c0_i32 : i32, i32
  }
}

</mosaic_0001>

<bundles_post_ra>
// kernel: tpu_custom_call.1
= control target key start
LH: loop header
LB: loop body
LE: loop exit
PB: predicated region body
PF: predicated region fallthrough
CT: control target
= control target key end

     0   :  { %17 = vsyncpa [#allocation3], 0  ;;  %s619_s0 = inlined_call_operand.vmem [shape: f32[8,32], index: 0, kind: input, shape index: {}]   ;;  %s620_s1 = inlined_call_operand.vmem [shape: f32[8,8], index: 1, kind: input, shape index: {}]   ;;  %s621_s2 = inlined_call_operand.vmem [shape: bf16[32,16], index: 2, kind: input, shape index: {}]   ;;  %s622_s3 = inlined_call_operand.vmem [shape: f32[1,16], index: 3, kind: input, shape index: {}]   ;;  %s623_s4 = inlined_call_operand.vmem [shape: bf16[16,16], index: 4, kind: input, shape index: {}]   ;;  %s624_s5 = inlined_call_operand.hbm [shape: f32[1,16], index: 5, kind: input, shape index: {}]   ;;  %s625_s6 = inlined_call_operand.hbm [shape: bf16[8,16], index: 6, kind: input, shape index: {}]   ;;  %s626_s7 = inlined_call_operand.vmem [shape: f32[1,16], index: 7, kind: input, shape index: {}]   ;;  %s627_s8 = inlined_call_operand.vmem [shape: bf16[16,32], index: 8, kind: input, shape index: {}]   ;;  %s628_s9 = inlined_call_operand.vmem [shape: f32[1,32], index: 9, kind: input, shape index: {}]   ;;  %s629_s10 = inlined_call_operand.hbm [shape: bf16[8,32], index: 10, kind: output, shape index: {0}]   ;;  %s630_s11 = inlined_call_operand.hbm [shape: f32[8,16], index: 11, kind: output, shape index: {1}]  }
   0x1   :  { %18 = vsyncpa [#allocation6], 0 }
   0x2   :  { %19 = vsyncpa [#allocation4], 0 }
   0x3   :  { %20 = vsyncpa [#allocation9], 0  ;;  %s506_s17 = smov [#allocation2]   ;;  %s507_s19 = smov [#allocation5]  }
   0x4   :  { %s37_s18 = sshll.u32 %s506_s17, 4  ;;  %s47_s20 = sshll.u32 %s507_s19, 4  ;;  %s38_s18 = int_to_ptr.vmem [resolvable:$true] %s37_s18  ;;  %s48_s20 = int_to_ptr.vmem [resolvable:$true] %s47_s20 }
   0x5   :  { %s426_s21 = scalar_lea.vmem %s38_s18, 16  ;;  %s430_s22 = scalar_lea.vmem %s38_s18, 32 }
   0x6   :  { %p427_p0 = scmp.ne.s32.totalorder %s38_s18, %s426_s21  ;;  %p431_p1 = scmp.lt.s32.totalorder %s38_s18, %s38_s18 }
   0x7   :  { %p432_p2 = scmp.lt.s32.totalorder %s430_s22, %s426_s21 }
   0x9   :  { %p433_p3 = por %p432_p2, %p431_p1 }
   0xb   :  { %p434_p4 = pnand %p433_p3, %p427_p0 }
   0xd   :  { %437 = shalt.err (!%p434_p4)
}
   0xe   :  { %40 = dma.hbm_to_vmem [thread:$0]  %s624_s5, 16, %s38_s18, [#allocation3]  }
   0xf   :  { %s446_s25 = scalar_lea.vmem %s48_s20, 64  ;;  %p451_p6 = scmp.lt.s32.totalorder %s48_s20, %s48_s20 }
  0x10   :  { %p447_p5 = scmp.ne.s32.totalorder %s48_s20, %s446_s25  ;;  %p452_p7 = scmp.lt.s32.totalorder %s446_s25, %s446_s25 }
  0x12   :  { %p453_p8 = por %p452_p7, %p451_p6 }
  0x14   :  { %p454_p9 = pnand %p453_p8, %p447_p5 }
  0x16   :  { %457 = shalt.err (!%p454_p9)
}
  0x17   :  { %50 = dma.hbm_to_vmem [thread:$0]  %s625_s6, 64, %s48_s20, [#allocation6]  }
  0x18   :  { %498 = dma.done.wait [#allocation3], 16  }
  0x19   :  { %499 = vsyncadd [#allocation3], 4294967280 }
  0x1a   :  { %500 = dma.done.wait [#allocation6], 64  }
  0x1b   :  { %501 = vsyncadd [#allocation6], 4294967232  ;;  %v508_v0 = vmov 0.0   ;;  %vm509_vm0 = vmmov 0   ;;  %v410_v1 = vld [vmem:[%s621_s2 + $0x8] sm:$0xff]   ;;  %v411_v2 = vld [vmem:[%s621_s2] sm:$0xff]  }
  0x1c   :  { %377 = vmatprep.subr.bf16.mxu0 %v508_v0  ;;  %381 = vmatprep.mubr.msk.bf16.mxu0 %vm509_vm0, %v508_v0  ;;  %v64_v3 = vld [vmem:[%s619_s0] sm:$0xff]  ;;  %vm90_vm1 = vcmask 261120   ;;  %vm151_vm2 = vcmask 130048   ;;  %vm217_vm3 = vcmask 1043456   ;;  %vm213_vm4 = vcmask 64512  }
  0x1d   :  { %385 = vmatprep.subr.bf16.mxu1 %v508_v0  ;;  %387 = vmatprep.mubr.msk.bf16.mxu1 %vm509_vm0, %v508_v0  ;;  %v65_v4 = vpack.c.bf16 %v64_v3, %v64_v3  ;;  %v412_v5 = vld [vmem:[%s623_s4] sm:$0xff]   ;;  %s510_s4 = smov 120  }
  0x1e   :  { %378 = vmatpush3.bf16.msra.mxu0 %v410_v1  ;;  %386 = vmatpush3.bf16.msra.mxu1 %v412_v5  ;;  %v356_v6 = vld [vmem:[%s622_s3] ss:$0 sm:$0xff]  ;;  %v205_v14 = vld [vmem:[#allocation5] sm:$0xf] }
  0x1f   :  { %379 = vmatprep.subr.bf16.mxu0 %v508_v0  ;;  %391 = vmatprep.subr.bf16.mxu1 %v508_v0  ;;  %v219_v15 = vsel %vm217_vm3, %v205_v14, 0  ;;  %v360_v16 = vld [vmem:[#allocation2] ss:$0 sm:$0xff] }
  0x20   :  { %v413_v24 = vld [vmem:[%s627_s8] sm:$0xff]  }
  0x21   :  { %v66_v26 = vld [vmem:[%s620_s1] sm:$0xff]  ;;  %s511_s1 = smov [#allocation8]  }
  0x22   :  { %380 = vmatpush3.bf16.msra.mxu0 %v411_v2  ;;  %v363_v31 = vld [vmem:[%s626_s7] ss:$0 sm:$0xff]  ;;  %s342_s8 = sshll.u32 %s511_s1, 4  ;;  %s343_s8 = int_to_ptr.vmem [resolvable:$true] %s342_s8 }
  0x23   :  { %397 = vmatprep.subr.bf16.mxu0 %v508_v0  ;;  %s458_s20 = scalar_lea.vmem %s343_s8, 128  ;;  %p463_p11 = scmp.lt.s32.totalorder %s343_s8, %s343_s8 }
  0x24   :  { %p459_p10 = scmp.ne.s32.totalorder %s343_s8, %s458_s20  ;;  %p464_p12 = scmp.lt.s32.totalorder %s458_s20, %s458_s20 }
  0x25   :  { %382 = vmatmul.mubr.msk.bf16.vlgmr.msra.gmra.mxu0 %vm90_vm1, %v65_v4 }
  0x26   :  { %399 = vmatprep.mubr.msk.bf16.mxu0 %vm509_vm0, %v508_v0  ;;  %398 = vmatpush3.bf16.msra.mxu0 %v413_v24  ;;  %p465_p13 = por %p464_p12, %p463_p11 }
  0x28   :  { %p466_p0 = pnand %p465_p13, %p459_p10 }
  0xe5   :  { %v128_v7 = vpop.f32.mrf.mxu0 }
  0xe6   :  { %v129_v8 = vadd.f32 %v356_v6, %v128_v7 }
  0xe7   :  { %v383_v9 = vpop.f32.mrf.mxu0 }
  0xe8   :  { %v134_v10 = vmax.f32 %v129_v8, 0.0 }
  0xe9   :  { %v131_v11 = vpop.f32.mrf.mxu0 }
  0xea   :  { %v135_v12 = vpack.c.bf16 %v134_v10, %v134_v10 }
  0xeb   :  { %v384_v13 = vpop.f32.mrf.mxu0 }
  0xec   :  { %388 = vmatmul.mubr.msk.bf16.vlgmr.msra.gmra.mxu1 %vm151_vm2, %v135_v12 }
  0xed   :  { %393 = vmatprep.mubr.msk.bf16.mxu1 %vm509_vm0, %v508_v0  ;;  %392 = vmatpush3.bf16.msra.mxu1 %v219_v15 }
 0x1ac   :  { %v189_v17 = vpop.f32.mrf.mxu1 }
 0x1ad   :  { %v190_v18 = vadd.f32 %v360_v16, %v189_v17 }
 0x1ae   :  { %v389_v19 = vpop.f32.mrf.mxu1 }
 0x1af   :  { %v195_v20 = vmul.f32 0.5, %v190_v18  ;;  %325 = vst.msk [vmem:[#allocation8] sm:$0xff] %vm151_vm2, %v190_v18 }
 0x1b0   :  { %v192_v21 = vpop.f32.mrf.mxu1 }
 0x1b1   :  { %v196_v22 = vmul.f32 1.442695, %v195_v20 }
 0x1b2   :  { %v390_v23 = vpop.f32.mrf.mxu1 }
 0x1b3   :  { %414 = vpow2.f32 %v196_v22 }
 0x1c0   :  { %v415_v25 = vpop.eup %414 }
 0x1c1   :  { %199 = vrot.lane.b32.xlu0 %v415_v25, %s510_s4 }
 0x233   :  { %v200_v27 = vpop.permute.xlu0 %199 }
 0x234   :  { %v202_v28 = vmul.f32 %v200_v27, %v66_v26 }
 0x236   :  { %v203_v29 = vadd.f32 %v202_v28, %v190_v18 }
 0x238   :  { %v204_v30 = vpack.c.bf16 %v203_v29, %v203_v29 }
 0x23a   :  { %394 = vmatmul.mubr.msk.bf16.vlgmr.msra.gmra.mxu1 %vm213_vm4, %v204_v30 }
 0x2fa   :  { %v255_v32 = vpop.f32.mrf.mxu1 }
 0x2fb   :  { %v256_v33 = vadd.f32 %v363_v31, %v255_v32 }
 0x2fc   :  { %v395_v34 = vpop.f32.mrf.mxu1 }
 0x2fd   :  { %v261_v35 = vmax.f32 %v256_v33, 0.0 }
 0x2fe   :  { %v258_v36 = vpop.f32.mrf.mxu1 }
 0x2ff   :  { %v262_v37 = vpack.c.bf16 %v261_v35, %v261_v35 }
 0x300   :  { %v396_v38 = vpop.f32.mrf.mxu1 }
 0x301   :  { %400 = vmatmul.mubr.msk.bf16.vlgmr.msra.gmra.mxu0 %vm151_vm2, %v262_v37 }
 0x302   :  { %469 = shalt.err (!%p466_p0)
}
 0x303   :  { %345 = dma.vmem_to_hbm [thread:$0]  %s343_s8, 128, %s630_s11, [#allocation9]   ;;  %v365_v39 = vld [vmem:[%s628_s9] ss:$0 sm:$0xff]  ;;  %vm323_vm5 = vcmask 257024  }
 0x304   :  { %s512_s24 = smov [#allocation7]  }
 0x305   :  { %s332_s25 = sshll.u32 %s512_s24, 4  ;;  %s333_s25 = int_to_ptr.vmem [resolvable:$true] %s332_s25 }
 0x306   :  { %s478_s26 = scalar_lea.vmem %s333_s25, 64  ;;  %p483_p2 = scmp.lt.s32.totalorder %s333_s25, %s333_s25 }
 0x307   :  { %p479_p1 = scmp.ne.s32.totalorder %s333_s25, %s478_s26  ;;  %p484_p3 = scmp.lt.s32.totalorder %s478_s26, %s478_s26 }
 0x309   :  { %p485_p4 = por %p484_p3, %p483_p2 }
 0x30b   :  { %p486_p5 = pnand %p485_p4, %p479_p1 }
 0x3c1   :  { %v315_v40 = vpop.f32.mrf.mxu0 }
 0x3c2   :  { %v316_v41 = vadd.f32 %v365_v39, %v315_v40 }
 0x3c3   :  { %v401_v42 = vpop.f32.mrf.mxu0 }
 0x3c4   :  { %416 = vtanh.f32 %v316_v41 }
 0x3c5   :  { %v318_v43 = vpop.f32.mrf.mxu0 }
 0x3c7   :  { %v402_v44 = vpop.f32.mrf.mxu0 }
 0x3d1   :  { %v417_v45 = vpop.eup %416 }
 0x3d2   :  { %v322_v46 = vpack.c.bf16 %v417_v45, %v417_v45 }
 0x3d4   :  { %324 = vst.msk [vmem:[#allocation7] sm:$0xf] %vm323_vm5, %v322_v46 }
 0x3d5   :  { %489 = shalt.err (!%p486_p5)
}
 0x3d6   :  { %335 = dma.vmem_to_hbm [thread:$0]  %s333_s25, 64, %s629_s10, [#allocation4]  }
 0x3d7   :  { %502 = dma.done.wait [#allocation4], 64  }
 0x3d8   :  { %503 = vsyncadd [#allocation4], 4294967232 }
 0x3d9   :  { %504 = dma.done.wait [#allocation9], 128  }
 0x3da   :  { %505 = vsyncadd [#allocation9], 4294967168 }
 0x3db   :  { %352 = vsyncpa [#allocation3], 1 }
 0x3dc   :  { %353 = vsyncpa [#allocation6], 1 }
 0x3dd   :  { %354 = vsyncpa [#allocation4], 1 }
 0x3de   :  { %355 = vsyncpa [#allocation9], 1 }

</bundles_post_ra>
